<compile_context>
chip_gen: v7x
topology: tpu7x:2x2x1
jax: 0.10.0
libtpu: 0.0.40
codegen_flags: <defaults>
</compile_context>

<pallas_src>
import jax
import jax.numpy as jnp
from jax.experimental import pallas as pl
from jax.experimental.pallas import tpu as pltpu


def gated_fusion_kernel(dec_ref, x_ref, w_ref, b_ref, o_ref):
    # dec_ref / x_ref / o_ref blocks: (C, T); w_ref: (C, C); b_ref: (C, 1)
    dec = dec_ref[...]                       # input dtype
    x = x_ref[...]                           # input dtype
    fused = x * dec                          # x * dec, input dtype (VPU)

    # 1x1 conv over channels: z[c, p] = sum_k w[c, k] * fused[k, p] + b[c]
    z = jnp.dot(w_ref[...], fused, preferred_element_type=jnp.float32)
    gate = jax.nn.sigmoid(z + b_ref[...].astype(jnp.float32))   # f32, (C, T)

    # gate*dec + (1-gate)*x  ==  x + gate*(dec - x)   (blend in input dtype)
    gate = gate.astype(x.dtype)
    o_ref[...] = (x + gate * (dec - x)).astype(o_ref.dtype)


def _vmem_budget_bytes():
    # Generation-aware budget: ~3/4 of physical VMEM, capped at 100 MiB
    # (v7x: 64 MiB -> 48 MiB; v5e/v6e: 128 MiB -> 96 MiB).
    try:
        cap = int(pltpu.get_tpu_info().vmem_capacity_bytes)
    except Exception:
        cap = 64 * 1024 * 1024  # conservative fallback (works on all chips)
    return min((cap * 3) // 4, 100 * 1024 * 1024)


def _choose_hw_tile(C, HW, itemsize, vmem_budget):
    # Per-pixel-column footprint:
    #   double-buffered dec/x/out tiles (3 arrays x 2 buffers, input dtype)
    # + ~7 live f32 (C, T) compute temporaries (fused, z, gate, blend, ...).
    per_col = C * (3 * 2 * itemsize + 7 * 4)
    # Leave ~2x headroom inside the budget; tiles capped at 2048 lanes
    # (>=512 lanes already reaches ~85% of HBM roofline on v6e).
    t = max(128, min(2048, (vmem_budget // 2) // max(per_col, 1)))
    t = (t // 128) * 128
    if t >= HW:
        return HW          # full last dim: legal for any HW, no tail block
    return t               # multiple of 128; tail block masked by Pallas


def gated_fusion(dec_nchw, x_nchw, w, b):
    """dec_nchw, x_nchw: (N, C, H, W); w: (C, C) 1x1-conv weight; b: (C,) bias."""
    N, C, H, W = dec_nchw.shape
    HW = H * W
    dtype = dec_nchw.dtype
    itemsize = jnp.dtype(dtype).itemsize

    # (N, C, H, W) -> (N, C, HW) is a free, contiguous reshape (no HBM pass).
    dec3 = dec_nchw.reshape(N, C, HW)
    x3 = x_nchw.reshape(N, C, HW)
    b2 = b.reshape(C, 1)

    vmem_budget = _vmem_budget_bytes()
    T = _choose_hw_tile(C, HW, itemsize, vmem_budget)
    grid = (N, pl.cdiv(HW, T))

    cost = pl.CostEstimate(
        flops=2 * N * C * C * HW + 4 * N * C * HW,
        transcendentals=N * C * HW,
        bytes_accessed=3 * N * C * HW * itemsize
        + C * C * jnp.dtype(w.dtype).itemsize
        + C * jnp.dtype(b.dtype).itemsize,
    )

    out3 = pl.pallas_call(
        gated_fusion_kernel,
        out_shape=jax.ShapeDtypeStruct((N, C, HW), dtype),
        grid_spec=pltpu.PrefetchScalarGridSpec(
            num_scalar_prefetch=0,
            grid=grid,
            in_specs=[
                pl.BlockSpec((None, C, T), lambda n, j: (n, 0, j)),  # dec
                pl.BlockSpec((None, C, T), lambda n, j: (n, 0, j)),  # x
                pl.BlockSpec((C, C), lambda n, j: (0, 0)),           # weight
                pl.BlockSpec((C, 1), lambda n, j: (0, 0)),           # bias
            ],
            out_specs=pl.BlockSpec((None, C, T), lambda n, j: (n, 0, j)),
        ),
        compiler_params=pltpu.CompilerParams(
            dimension_semantics=("parallel", "parallel"),
            vmem_limit_bytes=vmem_budget,
        ),
        cost_estimate=cost,
    )(dec3, x3, w, b2)

    return out3.reshape(N, C, H, W)


def gated_fusion_ref(dec, x, w, b):
    # Pure-JAX reference matching the PyTorch module.
    fused = x * dec
    z = jnp.einsum('ok,nkhw->nohw', w, fused) + b[None, :, None, None]
    gate = jax.nn.sigmoid(z)
    return gate * dec + (1.0 - gate) * x


if __name__ == "__main__":
    key = jax.random.PRNGKey(0)
    k_dec, k_x, k_w, k_b = jax.random.split(key, 4)

    N, C, H, W = 2, 4, 16, 16

    dec = jax.random.normal(k_dec, (N, C, H, W), dtype=jnp.float32)
    x = jax.random.normal(k_x, (N, C, H, W), dtype=jnp.float32)
    # gate_conv = Conv2d(C, C, kernel_size=1) -> weight (C, C), bias (C,)
    w = jax.random.normal(k_w, (C, C), dtype=jnp.float32) * 0.5
    b = jax.random.normal(k_b, (C,), dtype=jnp.float32) * 0.1

    out = gated_fusion(dec, x, w, b)
    out = jax.block_until_ready(out)

    ref = gated_fusion_ref(dec, x, w, b)
    assert out.shape == (N, C, H, W)
    assert jnp.allclose(out, ref, atol=1e-5, rtol=1e-5), "mismatch vs reference"

    print("KERNEL_OK")
</pallas_src>

<mosaic_0001>
module attributes {stable_mosaic.version = 11 : i64} {
  func.func @gated_fusion_kernel(%arg0: i32, %arg1: i32, %arg2: memref<1x4x256xf32, #tpu.memory_space<vmem>>, %arg3: memref<1x4x256xf32, #tpu.memory_space<vmem>>, %arg4: memref<4x4xf32, #tpu.memory_space<vmem>>, %arg5: memref<4x1xf32, #tpu.memory_space<vmem>>, %arg6: memref<1x4x256xf32, #tpu.memory_space<vmem>>) attributes {dimension_semantics = [#tpu.dimension_semantics<parallel>, #tpu.dimension_semantics<parallel>], iteration_bounds = array<i64: 2, 1>, scalar_prefetch = 0 : i64, scratch_operands = 0 : i64, tpu.core_type = #tpu.core_type<tc>, window_params = [{transform_indices = @transform_0, window_bounds = array<i64: 1, 4, 256>}, {transform_indices = @transform_1, window_bounds = array<i64: 1, 4, 256>}, {pipeline_mode = #tpu.pipeline_mode<synchronous>, transform_indices = @transform_2, window_bounds = array<i64: 4, 4>}, {pipeline_mode = #tpu.pipeline_mode<synchronous>, transform_indices = @transform_3, window_bounds = array<i64: 4, 1>}, {transform_indices = @transform_4, window_bounds = array<i64: 1, 4, 256>}]} {
    %c0 = arith.constant 0 : index
    %c0_0 = arith.constant 0 : index
    %c0_1 = arith.constant 0 : index
    %0 = vector.load %arg2[%c0, %c0_0, %c0_1] : memref<1x4x256xf32, #tpu.memory_space<vmem>>, vector<1x4x256xf32>
    %1 = vector.shape_cast %0 : vector<1x4x256xf32> to vector<4x256xf32>
    %c0_2 = arith.constant 0 : index
    %c0_3 = arith.constant 0 : index
    %c0_4 = arith.constant 0 : index
    %2 = vector.load %arg3[%c0_2, %c0_3, %c0_4] : memref<1x4x256xf32, #tpu.memory_space<vmem>>, vector<1x4x256xf32>
    %3 = vector.shape_cast %2 : vector<1x4x256xf32> to vector<4x256xf32>
    %4 = arith.mulf %3, %1 : vector<4x256xf32>
    %c0_5 = arith.constant 0 : index
    %c0_6 = arith.constant 0 : index
    %5 = vector.load %arg4[%c0_5, %c0_6] : memref<4x4xf32, #tpu.memory_space<vmem>>, vector<4x4xf32>
    %cst = arith.constant dense<0.000000e+00> : vector<4x256xf32>
    %6 = tpu.matmul %5, %4, %cst {dimension_numbers = #tpu.dot_dimension_numbers<[1], [0], [0], [1], [0, 0, 1, 1], [], []>} : vector<4x4xf32>, vector<4x256xf32>, vector<4x256xf32> -> vector<4x256xf32>
    %c0_7 = arith.constant 0 : index
    %c0_8 = arith.constant 0 : index
    %7 = vector.load %arg5[%c0_7, %c0_8] : memref<4x1xf32, #tpu.memory_space<vmem>>, vector<4x1xf32>
    %8 = vector.broadcast %7 : vector<4x1xf32> to vector<4x256xf32>
    %9 = arith.addf %6, %8 : vector<4x256xf32>
    %10 = arith.negf %9 : vector<4x256xf32>
    %11 = math.exp %10 : vector<4x256xf32>
    %cst_9 = arith.constant 1.000000e+00 : f32
    %12 = vector.broadcast %cst_9 : f32 to vector<4x256xf32>
    %13 = arith.addf %12, %11 : vector<4x256xf32>
    %14 = arith.divf %12, %13 : vector<4x256xf32>
    %15 = arith.subf %1, %3 : vector<4x256xf32>
    %16 = arith.mulf %14, %15 : vector<4x256xf32>
    %17 = arith.addf %3, %16 : vector<4x256xf32>
    %c0_10 = arith.constant 0 : index
    %c0_11 = arith.constant 0 : index
    %c0_12 = arith.constant 0 : index
    %18 = vector.load %arg6[%c0_10, %c0_11, %c0_12] : memref<1x4x256xf32, #tpu.memory_space<vmem>>, vector<1x4x256xf32>
    %19 = vector.shape_cast %18 : vector<1x4x256xf32> to vector<4x256xf32>
    %20 = vector.shape_cast %17 : vector<4x256xf32> to vector<1x4x256xf32>
    tpu.vector_store %arg6[%c0_10, %c0_11, %c0_12], %20 {strides = array<i32>} : memref<1x4x256xf32, #tpu.memory_space<vmem>>, vector<1x4x256xf32>,
    return
  }
  func.func @transform_0(%arg0: i32, %arg1: i32) -> (i32, i32, i32) {
    %c0_i32 = arith.constant 0 : i32
    %c0_i32_0 = arith.constant 0 : i32
    return %arg0, %c0_i32, %arg1 : i32, i32, i32
  }
  func.func @transform_1(%arg0: i32, %arg1: i32) -> (i32, i32, i32) {
    %c0_i32 = arith.constant 0 : i32
    %c0_i32_0 = arith.constant 0 : i32
    return %arg0, %c0_i32, %arg1 : i32, i32, i32
  }
  func.func @transform_2(%arg0: i32, %arg1: i32) -> (i32, i32) {
    %c0_i32 = arith.constant 0 : i32
    %c0_i32_0 = arith.constant 0 : i32
    %c0_i32_1 = arith.constant 0 : i32
    return %c0_i32, %c0_i32_0 : i32, i32
  }
  func.func @transform_3(%arg0: i32, %arg1: i32) -> (i32, i32) {
    %c0_i32 = arith.constant 0 : i32
    %c0_i32_0 = arith.constant 0 : i32
    %c0_i32_1 = arith.constant 0 : i32
    return %c0_i32, %c0_i32_0 : i32, i32
  }
  func.func @transform_4(%arg0: i32, %arg1: i32) -> (i32, i32, i32) {
    %c0_i32 = arith.constant 0 : i32
    %c0_i32_0 = arith.constant 0 : i32
    return %arg0, %c0_i32, %arg1 : i32, i32, i32
  }
}

</mosaic_0001>

<bundles_post_ra>
// kernel: tpu_custom_call.1
= control target key start
LH: loop header
LB: loop body
LE: loop exit
PB: predicated region body
PF: predicated region fallthrough
CT: control target
= control target key end

     0   :  { %9 = vsyncpa [#allocation3], 0  ;;  %s1034_s0 = inlined_call_operand.hbm [shape: f32[2,4,256], index: 0, kind: input, shape index: {}]   ;;  %s1035_s1 = inlined_call_operand.hbm [shape: f32[2,4,256], index: 1, kind: input, shape index: {}]   ;;  %s1036_s2 = inlined_call_operand.vmem [shape: f32[4,4], index: 2, kind: input, shape index: {}]   ;;  %s1037_s3 = inlined_call_operand.vmem [shape: f32[4,1], index: 3, kind: input, shape index: {}]   ;;  %s1038_s4 = inlined_call_operand.hbm [shape: f32[2,4,256], index: 4, kind: output, shape index: {}]  }
   0x1   :  { %11 = vsyncpa [#allocation3 + $0x1], 0 }
   0x2   :  { %12 = vsyncpa [#allocation6], 0 }
   0x3   :  { %14 = vsyncpa [#allocation6 + $0x1], 0 }
   0x4   :  { %15 = vsyncpa [#allocation4], 0 }
   0x5   :  { %17 = vsyncpa [#allocation4 + $0x1], 0  ;;  %s803_s15 = smov 0   ;;  %s805_s16 = smov 0  }
   0x6   :  { %s807_s17 = smov 0   ;;  %s809_s18 = smov 0  }
   0x7   :  { %s811_s19 = smov 0   ;;  %s813_s20 = smov 0  }
   0x8 LB: > { %s520_s21 = sadd.s32 4294967295, %s771_s20   ;;  %s521_s22 = sadd.s32 4294967294, %s771_s20   ;;  %s771_s20 = sphi %s813_s20, %s23_s20   ;;  %s767_s19 = sphi %s811_s19, %s1058_s19   ;;  %s763_s18 = sphi %s809_s18, %s1057_s18   ;;  %s759_s17 = sphi %s807_s17, %s1056_s17   ;;  %s755_s16 = sphi %s805_s16, %s1055_s16   ;;  %s751_s15 = sphi %s803_s15, %s1054_s15  }
   0x9   : > { %s35_s23 = sadd.s32 1, %s767_s19  ;;  %s44_s24 = sadd.s32 1, %s759_s17 }
   0xa   : > { %p37_p0 = scmp.ge.s32.totalorder %s35_s23, 2  ;;  %p51_p1 = scmp.ne.s32.totalorder %s759_s17, %s755_s16 }
   0xb   : > { %p52_p2 = scmp.eq.s32.totalorder %s771_s20, 0  ;;  %p57_p3 = scmp.ne.s32.totalorder %s755_s16, %s751_s15 }
   0xc   : > { %s1060_s23 = smov (%p37_p0, %s35_s23), 0  ;;  %p58_p5 = scmp.eq.s32.totalorder %s520_s21, 0 }
   0xd   : > { %p844_p4 = por %p52_p2, %p51_p1  ;;  %s39_s26 = ssub.s32 %s767_s19, %s1060_s23 }
   0xe   : > { %p153_p6 = scmp.eq.s32.totalorder %s520_s21, 1  ;;  %p42_p7 = scmp.eq.s32.totalorder %s39_s26, 0 }
   0xf   : > { %p850_p8 = por %p58_p5, %p57_p3  ;;  %p159_p10 = scmp.eq.s32.totalorder %s521_s22, 1 }
  0x10   : > { %p854_p9 = por %p153_p6, %p51_p1  ;;  %p564_p13 = scmp.lt.s32.totalorder %s771_s20, 2 }
  0x11   : > { %s1042_s27 = scalar_select %p850_p8, 1, 0 }
  0x12   : > { %s1043_s28 = scalar_select %p854_p9, 1, 0 }
  0x13   : > { %s859_s29 = scalar_select %p42_p7, %s759_s17, %s44_s24  }
  0x14   : > { %p861_p11 = por %p159_p10, %p57_p3  ;;  %s868_s5 = sand.u32 1, %s759_s17  }
  0x15   : > { %s524_s6 = sshll.u32 %s868_s5, 3  ;;  %s544_s7 = sshll.u32 %s767_s19, 7 }
  0x16   : > { %s1044_s30 = scalar_select %p861_p11, 1, 0 }
  0x17   : > { %s877_s10 = scalar_lea.hbm %s1034_s0, %s544_s7  ;;  %s189_s11 = scalar_lea.vmem [#allocation2], %s524_s6 }
  0x18   : > { %s199_s12 = sshll.u32 %s189_s11, 4  ;;  %p885_p0 = pnand %p564_p13, %p844_p4  ;;  %s881_s12 = int_to_ptr.vmem [resolvable:$true] %s199_s12 }
  0x19   : > { %s186_s14 = scalar_lea.sflag [#allocation3], %s868_s5  ;;  %s625_s21 = scalar_lea.hbm %s877_s10, 128 }
  0x1a   : > { %p626_p3 = scmp.ne.s32.totalorder %s877_s10, %s625_s21  ;;  %p627_p5 = pneg %p885_p0 }
  0x1b   : > { %s630_s25 = scalar_lea.hbm %s1034_s0, 256  ;;  %p631_p4 = scmp.lt.u32.totalorder %s877_s10, %s1034_s0 }
  0x1c   : > { %p628_p6 = pnand %p627_p5, %p626_p3  ;;  %p632_p10 = scmp.lt.u32.totalorder %s630_s25, %s625_s21 }
  0x1d   : > { %p634_p12 = scmp.lt.u32.totalorder %s625_s21, %s877_s10 }
  0x1e   : > { %p629_p7 = pneg %p628_p6  ;;  %p633_p13 = por %p632_p10, %p631_p4 }
  0x20   : > { %p635_p1 = por %p634_p12, %p633_p13 }
  0x22   : > { %p636_p2 = pnand %p635_p1, %p629_p7 }
  0x24   : > { %639 = shalt.err (!%p636_p2)
}
  0x25   : > { %s640_s9 = scalar_lea.vmem %s881_s12, 128  ;;  %s773_s11 = smov [#allocation2]  }
  0x26   : > { %p641_p3 = scmp.ne.s32.totalorder %s881_s12, %s640_s9  ;;  %s645_s22 = sshll.u32 %s773_s11, 4  ;;  %s646_s22 = int_to_ptr.vmem [resolvable:$false] %s645_s22 }
  0x27   : > { %s647_s24 = scalar_lea.vmem %s646_s22, 256  ;;  %p648_p9 = scmp.lt.s32.totalorder %s881_s12, %s646_s22 }
  0x28   : > { %p643_p6 = pnand %p641_p3, %p627_p5  ;;  %p649_p4 = scmp.lt.s32.totalorder %s647_s24, %s640_s9 }
  0x2a   : > { %p644_p11 = pneg %p643_p6  ;;  %p650_p10 = por %p649_p4, %p648_p9 }
  0x2c   : > { %p651_p12 = pnand %p650_p10, %p644_p11 }
  0x2e   : > { %654 = shalt.err (!%p651_p12)
}
  0x2f   : > { %556 = dma.hbm_to_vmem [thread:$0]  (!%p885_p0), %s877_s10, 128, %s881_s12, %s186_s14  }
  0x30   : > { %p1046_p1 = scmp.lt.s32.totalorder %s771_s20, 3  ;;  %p1047_p2 = scmp.ge.s32.totalorder %s771_s20, 1 }
  0x31   : > { %s930_s8 = scalar_lea.hbm %s1035_s1, %s544_s7  ;;  %s210_s9 = scalar_lea.vmem [#allocation5], %s524_s6 }
  0x32   : > { %p921_p7 = pnand %p1047_p2, %p1046_p1  ;;  %s220_s11 = sshll.u32 %s210_s9, 4  ;;  %s221_s11 = int_to_ptr.vmem [resolvable:$true] %s220_s11 }
  0x33   : > { %s207_s10 = scalar_lea.sflag [#allocation6], %s868_s5  ;;  %s655_s12 = scalar_lea.hbm %s930_s8, 128 }
  0x34   : > { %s1048_s21 = scalar_select %p921_p7, 1, 0 }
  0x35   : > { %p656_p9 = scmp.ne.s32.totalorder %s930_s8, %s655_s12  ;;  %s660_s7 = scalar_lea.hbm %s1035_s1, 256 }
  0x36   : > { %p661_p3 = scmp.lt.u32.totalorder %s930_s8, %s1035_s1  ;;  %p662_p6 = scmp.lt.u32.totalorder %s660_s7, %s655_s12 }
  0x37   : > { %p658_p11 = pnand %p656_p9, %p627_p5  ;;  %p664_p10 = scmp.lt.u32.totalorder %s655_s12, %s930_s8 }
  0x38   : > { %p663_p4 = por %p662_p6, %p661_p3 }
  0x39   : > { %p659_p13 = pneg %p658_p11 }
  0x3a   : > { %p665_p12 = por %p664_p10, %p663_p4 }
  0x3c   : > { %p666_p1 = pnand %p665_p12, %p659_p13 }
  0x3e   : > { %669 = shalt.err (!%p666_p1)
}
  0x3f   : > { %s670_s5 = scalar_lea.vmem %s221_s11, 128  ;;  %s774_s6 = smov [#allocation5]  }
  0x40   : > { %p671_p2 = scmp.ne.s32.totalorder %s221_s11, %s670_s5  ;;  %s675_s26 = sshll.u32 %s774_s6, 4  ;;  %s676_s26 = int_to_ptr.vmem [resolvable:$false] %s675_s26 }
  0x41   : > { %s677_s9 = scalar_lea.vmem %s676_s26, 256  ;;  %p678_p8 = scmp.lt.s32.totalorder %s221_s11, %s676_s26 }
  0x42   : > { %p673_p9 = pnand %p671_p2, %p627_p5  ;;  %p679_p7 = scmp.lt.s32.totalorder %s677_s9, %s670_s5 }
  0x44   : > { %p674_p11 = pneg %p673_p9  ;;  %p680_p3 = por %p679_p7, %p678_p8 }
  0x46   : > { %p681_p6 = pnand %p680_p3, %p674_p11 }
  0x48   : > { %684 = shalt.err (!%p681_p6)
}
  0x49   : > { %559 = dma.hbm_to_vmem [thread:$0]  (!%p885_p0), %s930_s8, 128, %s221_s11, %s207_s10  }
  0x4a   : > { %p1049_p13 = scmp.ne.s32.totalorder %s1048_s21, 0 }
  0x4b   : > { %s957_s12 = sand.u32 (!%p1049_p13), 1, %s755_s16   ;;  %p1050_p8 = scmp.ne.s32.totalorder (!%p1049_p13), %s1042_s27, 0 }
  0x4c   : > { %229 = sbr.rel (%p1049_p13) target bundleno = 354 (0x162), region = 36  ;;  %s960_s14 = sshll.u32 (!%p1049_p13), %s957_s12, 3 }
  0x4d   : > { %s232_s22 = scalar_lea.sflag (!%p1049_p13), [#allocation3], %s957_s12  ;;  %s235_s7 = scalar_lea.vmem (!%p1049_p13), [#allocation2], %s960_s14 }
  0x53   : > { %738 = dma.done.wait (%p1050_p8), %s232_s22, 128  }
  0x54   : > { %740 = vsyncadd (%p1050_p8), %s232_s22, 4294967168  ;;  %s241_s13 = scalar_lea.sflag [#allocation6], %s957_s12  ;;  %s244_s21 = scalar_lea.vmem [#allocation5], %s960_s14 }
  0x55   : > { %742 = dma.done.wait (%p1050_p8), %s241_s13, 128  }
  0x56   : > { %744 = vsyncadd (%p1050_p8), %s241_s13, 4294967168  ;;  %v775_v0 = vmov 0.0   ;;  %v776_v1 = vmov 0   ;;  %v277_v2 = vld [vmem:[%s235_s7] sm:$0xff]  ;;  %v278_v3 = vld [vmem:[%s244_s21] sm:$0xff]  ;;  %vm293_vm0 = vcmask 1043456  }
  0x57   : > { %362 = vmatprep.mubr.f32.mxu0 %v775_v0  ;;  %616 = vset.pattern.permute.xlu0 %v776_v1  ;;  %v279_v4 = vmul.f32 %v278_v3, %v277_v2  ;;  %v281_v5 = vld [vmem:[%s1037_s3] sm:$0xf]  ;;  %vm289_vm1 = vcmask 31744   ;;  %v381_v19 = vsub.f32 %v277_v2, %v278_v3  ;;  %s546_s27 = sshll.u32 %s763_s18, 7  ;;  %s273_s25 = scalar_lea.vmem [#allocation7], %s960_s14 }
  0x58   : > { %284 = vperm.xlu0 %616, %v281_v5   ;;  %v280_v7 = vld [vmem:[%s1036_s2] sm:$0xf]  ;;  %s410_s5 = sshll.u32 %s273_s25, 4  ;;  %s985_s9 = scalar_lea.hbm %s1038_s4, %s546_s27  ;;  %s987_s5 = int_to_ptr.vmem [resolvable:$true] %s410_s5 }
  0x59   : > { %v288_v6 = vcombine.high %v279_v4, %v279_v4  ;;  %v383_v20 = vcombine.high %v381_v19, %v381_v19  ;;  %s394_s22 = scalar_lea.sflag [#allocation4], %s957_s12  ;;  %s685_s7 = scalar_lea.vmem %s987_s5, 128 }
  0x5a   : > { %p686_p0 = scmp.ne.s32.totalorder %s987_s5, %s685_s7  ;;  %p1051_p5 = scmp.ne.s32.totalorder %s1043_s28, 0 }
  0x5b   : > { %534 = vmatprep.subr.msk.mxu0 %vm293_vm0, %v288_v6  ;;  %s777_s18 = smov [#allocation7]  }
  0x5c   : > { %535 = vmatpush1.msk.msra.mxu0 %vm293_vm0, %v279_v4  ;;  %p687_p7 = pnand %p686_p0, %p1051_p5  ;;  %s689_s14 = sshll.u32 %s777_s18, 4  ;;  %s690_s14 = int_to_ptr.vmem [resolvable:$false] %s689_s14 }
  0x5d   : > { %536 = vmatmul.mubr.msk.f32.vlgmr.msra.gmra.mrb[0].mxu0 %vm289_vm1, %v280_v7  ;;  %s691_s13 = scalar_lea.vmem %s690_s14, 256  ;;  %p692_p10 = scmp.lt.s32.totalorder %s987_s5, %s690_s14 }
  0x5e   : > { %p688_p4 = pneg %p687_p7  ;;  %p693_p12 = scmp.lt.s32.totalorder %s691_s13, %s685_s7 }
  0x60   : > { %p694_p1 = por %p693_p12, %p692_p10 }
  0x62   : > { %p695_p2 = pnand %p694_p1, %p688_p4 }
  0xd7   : > { %v285_v8 = vpop.permute.xlu0 %284 }
 0x130   : > { %v364_v9 = vpop.f32.mrb[0].mxu0 }
 0x131   : > { %v365_v10 = vadd.f32 %v364_v9, %v285_v8  ;;  %v366_v11 = vpop.f32.mrb[1].mxu0 }
 0x132   : > { %v367_v12 = vadd.f32 %v366_v11, %v285_v8 }
 0x133   : > { %v537_v13 = vmul.f32 -1.442695, %v365_v10 }
 0x134   : > { %v538_v14 = vmul.f32 -1.442695, %v367_v12 }
 0x135   : > { %617 = vpow2.f32 %v537_v13 }
 0x136   : > { %619 = vpow2.f32 %v538_v14 }
 0x13f   : > { %v618_v15 = vpop.eup %617 }
 0x140   : > { %v620_v16 = vpop.eup %619  ;;  %v375_v17 = vadd.f32 1.0, %v618_v15 }
 0x141   : > { %v376_v18 = vadd.f32 1.0, %v620_v16 }
 0x142   : > { %621 = vrcp.f32 %v375_v17 }
 0x143   : > { %623 = vrcp.f32 %v376_v18 }
 0x14c   : > { %v622_v21 = vpop.eup %621 }
 0x14d   : > { %v624_v22 = vpop.eup %623  ;;  %v385_v23 = vmul.f32 %v622_v21, %v381_v19 }
 0x14e   : > { %v386_v24 = vmul.f32 %v624_v22, %v383_v20 }
 0x150   : > { %v389_v25 = vcombine.low %v385_v23, %v386_v24 }
 0x152   : > { %v391_v26 = vadd.f32 %v389_v25, %v278_v3 }
 0x154   : > { %392 = vst [vmem:[%s273_s25] sm:$0xff] %v391_v26 }
 0x155   : > { %698 = shalt.err (!%p695_p2)
}
 0x156   : > { %s699_s12 = scalar_lea.hbm %s985_s9, 128  ;;  %s703_s11 = scalar_lea.hbm %s1038_s4, 256 }
 0x157   : > { %p700_p9 = scmp.ne.s32.totalorder %s985_s9, %s699_s12  ;;  %p704_p6 = scmp.lt.u32.totalorder %s985_s9, %s1038_s4 }
 0x158   : > { %p705_p13 = scmp.lt.u32.totalorder %s703_s11, %s699_s12  ;;  %p707_p0 = scmp.lt.u32.totalorder %s699_s12, %s985_s9 }
 0x159   : > { %p701_p11 = pnand %p700_p9, %p1051_p5 }
 0x15a   : > { %p706_p8 = por %p705_p13, %p704_p6 }
 0x15b   : > { %p702_p3 = pneg %p701_p11 }
 0x15c   : > { %p708_p7 = por %p707_p0, %p706_p8 }
 0x15e   : > { %p709_p4 = pnand %p708_p7, %p702_p3 }
 0x160   : > { %712 = shalt.err (!%p709_p4)
}
 0x161   : > { %551 = dma.vmem_to_hbm [thread:$0]  (%p1051_p5), %s987_s5, 128, %s985_s9, %s394_s22  }
 0x162 PF: > { %s422_s27 = sand.u32 1, %s751_s15   ;;  %p1052_p10 = scmp.ne.s32.totalorder %s1044_s30, 0 }
 0x163   : > { %p1053_p12 = scmp.ge.s32.totalorder %s771_s20, 2  ;;  %s423_s25 = scalar_lea.sflag [#allocation4], %s422_s27 }
 0x165   : > { %p561_p1 = pnand %p1053_p12, %p1052_p10 }
 0x167   : > { %746 = dma.done.wait (!%p561_p1), %s423_s25, 128  }
 0x168   : > { %748 = vsyncadd (!%p561_p1), %s423_s25, 4294967168  ;;  %s23_s20 = sadd.s32 1, %s771_s20   ;;  %s1054_s15 = smov %s755_s16 }
 0x169   : > { %p20_p2 = scmp.ge.s32.totalorder %s23_s20, 4   ;;  %s1055_s16 = smov %s759_s17 }
 0x16a   : > { %s1056_s17 = smov %s859_s29  ;;  %s1057_s18 = smov %s767_s19 }
 0x16b   : > { %s1058_s19 = smov %s1060_s23  ;;  %22 = sbr.rel (!%p20_p2) target bundleno = 8 (0x8), region = 94 }
 0x172   :  { %428 = vsyncpa [#allocation3], 1 }
 0x173   :  { %430 = vsyncpa [#allocation3 + $0x1], 1 }
 0x174   :  { %431 = vsyncpa [#allocation6], 1 }
 0x175   :  { %433 = vsyncpa [#allocation6 + $0x1], 1 }
 0x176   :  { %434 = vsyncpa [#allocation4], 1 }
 0x177   :  { %436 = vsyncpa [#allocation4 + $0x1], 1 }

</bundles_post_ra>
